<compile_context>
chip_gen: v7x
topology: tpu7x:2x2x1
jax: 0.10.0
libtpu: 0.0.40
codegen_flags: <defaults>
</compile_context>

<pallas_src>
import functools

import jax
import jax.numpy as jnp
from jax.experimental import pallas as pl
from jax.experimental.pallas import tpu as pltpu

LANE = 128


def _pad_to(n, m):
    return ((n + m - 1) // m) * m


def mlp_kernel(x_ref, w1_ref, b1_ref, w2_ref, b2_ref, w3_ref, b3_ref, o_ref):
    # One (tile_m, in_pad) row tile through the whole MLP.
    x = x_ref[...].astype(jnp.bfloat16)
    h1 = jnp.dot(x, w1_ref[...], preferred_element_type=jnp.float32) + b1_ref[...]
    h1 = jnp.maximum(h1, 0.0).astype(jnp.bfloat16)
    h2 = jnp.dot(h1, w2_ref[...], preferred_element_type=jnp.float32) + b2_ref[...]
    h2 = jnp.maximum(h2, 0.0).astype(jnp.bfloat16)
    out = jnp.dot(h2, w3_ref[...], preferred_element_type=jnp.float32) + b3_ref[...]
    o_ref[...] = out.astype(o_ref.dtype)


def pad_params(w1, b1, w2, b2, w3, b3):
    """One-time prep: zero-pad to 128-lane multiples; weights in bf16, biases f32."""
    def pad_w(w):
        i, o = w.shape
        ip, op = _pad_to(i, LANE), _pad_to(o, LANE)
        wp = jnp.zeros((ip, op), jnp.bfloat16)
        return wp.at[:i, :o].set(w.astype(jnp.bfloat16))

    def pad_b(b):
        b = b.reshape(1, -1).astype(jnp.float32)
        o = b.shape[-1]
        op = _pad_to(o, LANE)
        bp = jnp.zeros((1, op), jnp.float32)
        return bp.at[:, :o].set(b)

    return pad_w(w1), pad_b(b1), pad_w(w2), pad_b(b2), pad_w(w3), pad_b(b3)


@functools.partial(jax.jit, static_argnames=("out_dim", "tile_m"))
def mlp_forward(x, w1p, b1p, w2p, b2p, w3p, b3p, *, out_dim, tile_m=128):
    B, in_dim = x.shape
    in_pad = w1p.shape[0]
    h1_pad = w1p.shape[1]
    h2_pad = w2p.shape[1]
    out_pad = w3p.shape[1]

    # Pad rows up to a whole number of MXU-friendly tiles and zero-pad the
    # trailing (unused) input lanes; padded weight rows are zero so results
    # in the valid region are unchanged.
    b_pad = _pad_to(B, tile_m)
    xp = jnp.zeros((b_pad, in_pad), jnp.float32).at[:B, :in_dim].set(x)

    grid = (b_pad // tile_m,)

    out = pl.pallas_call(
        mlp_kernel,
        out_shape=jax.ShapeDtypeStruct((b_pad, out_pad), jnp.float32),
        grid=grid,
        in_specs=[
            # x: stream one row tile per grid step.
            pl.BlockSpec((tile_m, in_pad), lambda i: (i, 0)),
            # Weights / biases: constant index_map -> loaded once, VMEM-resident.
            pl.BlockSpec((in_pad, h1_pad), lambda i: (0, 0)),
            pl.BlockSpec((1, h1_pad), lambda i: (0, 0)),
            pl.BlockSpec((h1_pad, h2_pad), lambda i: (0, 0)),
            pl.BlockSpec((1, h2_pad), lambda i: (0, 0)),
            pl.BlockSpec((h2_pad, out_pad), lambda i: (0, 0)),
            pl.BlockSpec((1, out_pad), lambda i: (0, 0)),
        ],
        out_specs=pl.BlockSpec((tile_m, out_pad), lambda i: (i, 0)),
        compiler_params=pltpu.CompilerParams(dimension_semantics=("parallel",)),
    )(xp, w1p, b1p, w2p, b2p, w3p, b3p)

    return out[:B, :out_dim]


def init_linear(key, fan_in, fan_out):
    # PyTorch nn.Linear default init: U(-1/sqrt(fan_in), 1/sqrt(fan_in))
    kw, kb = jax.random.split(key)
    bound = 1.0 / jnp.sqrt(float(fan_in))
    w = jax.random.uniform(kw, (fan_in, fan_out), jnp.float32, -bound, bound)
    b = jax.random.uniform(kb, (1, fan_out), jnp.float32, -bound, bound)
    return w, b


if __name__ == "__main__":
    window = 100
    output = 30
    batch = 256  # >= 128 rows per call so full MXU row tiles are used (grid of 2)

    key = jax.random.PRNGKey(0)
    k_x, k1, k2, k3 = jax.random.split(key, 4)

    x = jax.random.normal(k_x, (batch, window), jnp.float32)
    w1, b1 = init_linear(k1, window, 250)
    w2, b2 = init_linear(k2, 250, 100)
    w3, b3 = init_linear(k3, 100, output)

    params = pad_params(w1, b1, w2, b2, w3, b3)

    y = mlp_forward(x, *params, out_dim=output, tile_m=128)
    y = jax.block_until_ready(y)

    # Reference (plain JAX, f32, unpadded). bf16 MXU inputs -> relaxed tolerance.
    h1 = jnp.maximum(x @ w1 + b1, 0.0)
    h2 = jnp.maximum(h1 @ w2 + b2, 0.0)
    y_ref = h2 @ w3 + b3

    assert y.shape == (batch, output)
    max_err = float(jnp.max(jnp.abs(y - y_ref)))
    assert jnp.allclose(y, y_ref, atol=3e-2, rtol=3e-2), f"max abs err {max_err}"

    print("KERNEL_OK")
</pallas_src>

<mosaic_0001>
module attributes {stable_mosaic.version = 11 : i64} {
  func.func @mlp_kernel(%arg0: i32, %arg1: memref<128x128xf32, #tpu.memory_space<vmem>>, %arg2: memref<128x256xbf16, #tpu.memory_space<vmem>>, %arg3: memref<1x256xf32, #tpu.memory_space<vmem>>, %arg4: memref<256x128xbf16, #tpu.memory_space<vmem>>, %arg5: memref<1x128xf32, #tpu.memory_space<vmem>>, %arg6: memref<128x128xbf16, #tpu.memory_space<vmem>>, %arg7: memref<1x128xf32, #tpu.memory_space<vmem>>, %arg8: memref<128x128xf32, #tpu.memory_space<vmem>>) attributes {dimension_semantics = [#tpu.dimension_semantics<parallel>], iteration_bounds = array<i64: 2>, scalar_prefetch = 0 : i64, scratch_operands = 0 : i64, tpu.core_type = #tpu.core_type<tc>, window_params = [{transform_indices = @transform_0, window_bounds = array<i64: 128, 128>}, {pipeline_mode = #tpu.pipeline_mode<synchronous>, transform_indices = @transform_1, window_bounds = array<i64: 128, 256>}, {pipeline_mode = #tpu.pipeline_mode<synchronous>, transform_indices = @transform_2, window_bounds = array<i64: 1, 256>}, {pipeline_mode = #tpu.pipeline_mode<synchronous>, transform_indices = @transform_3, window_bounds = array<i64: 256, 128>}, {pipeline_mode = #tpu.pipeline_mode<synchronous>, transform_indices = @transform_4, window_bounds = array<i64: 1, 128>}, {pipeline_mode = #tpu.pipeline_mode<synchronous>, transform_indices = @transform_5, window_bounds = array<i64: 128, 128>}, {pipeline_mode = #tpu.pipeline_mode<synchronous>, transform_indices = @transform_6, window_bounds = array<i64: 1, 128>}, {transform_indices = @transform_7, window_bounds = array<i64: 128, 128>}]} {
    %c0 = arith.constant 0 : index
    %c0_0 = arith.constant 0 : index
    %0 = vector.load %arg1[%c0, %c0_0] : memref<128x128xf32, #tpu.memory_space<vmem>>, vector<128x128xf32>
    %1 = arith.truncf %0 : vector<128x128xf32> to vector<128x128xbf16>
    %c0_1 = arith.constant 0 : index
    %c0_2 = arith.constant 0 : index
    %2 = vector.load %arg2[%c0_1, %c0_2] : memref<128x256xbf16, #tpu.memory_space<vmem>>, vector<128x256xbf16>
    %cst = arith.constant dense<0.000000e+00> : vector<128x256xf32>
    %3 = tpu.matmul %1, %2, %cst {dimension_numbers = #tpu.dot_dimension_numbers<[1], [0], [0], [1], [0, 0, 1, 1], [], []>} : vector<128x128xbf16>, vector<128x256xbf16>, vector<128x256xf32> -> vector<128x256xf32>
    %c0_3 = arith.constant 0 : index
    %c0_4 = arith.constant 0 : index
    %4 = vector.load %arg3[%c0_3, %c0_4] : memref<1x256xf32, #tpu.memory_space<vmem>>, vector<1x256xf32>
    %5 = vector.broadcast %4 : vector<1x256xf32> to vector<128x256xf32>
    %6 = arith.addf %3, %5 : vector<128x256xf32>
    %cst_5 = arith.constant 0.000000e+00 : f32
    %7 = vector.broadcast %cst_5 : f32 to vector<128x256xf32>
    %8 = arith.maximumf %6, %7 : vector<128x256xf32>
    %9 = arith.truncf %8 : vector<128x256xf32> to vector<128x256xbf16>
    %c0_6 = arith.constant 0 : index
    %c0_7 = arith.constant 0 : index
    %10 = vector.load %arg4[%c0_6, %c0_7] : memref<256x128xbf16, #tpu.memory_space<vmem>>, vector<256x128xbf16>
    %cst_8 = arith.constant dense<0.000000e+00> : vector<128x128xf32>
    %11 = tpu.matmul %9, %10, %cst_8 {dimension_numbers = #tpu.dot_dimension_numbers<[1], [0], [0], [1], [0, 0, 1, 1], [], []>} : vector<128x256xbf16>, vector<256x128xbf16>, vector<128x128xf32> -> vector<128x128xf32>
    %c0_9 = arith.constant 0 : index
    %c0_10 = arith.constant 0 : index
    %12 = vector.load %arg5[%c0_9, %c0_10] : memref<1x128xf32, #tpu.memory_space<vmem>>, vector<1x128xf32>
    %13 = vector.broadcast %12 : vector<1x128xf32> to vector<128x128xf32>
    %14 = arith.addf %11, %13 : vector<128x128xf32>
    %cst_11 = arith.constant 0.000000e+00 : f32
    %15 = vector.broadcast %cst_11 : f32 to vector<128x128xf32>
    %16 = arith.maximumf %14, %15 : vector<128x128xf32>
    %17 = arith.truncf %16 : vector<128x128xf32> to vector<128x128xbf16>
    %c0_12 = arith.constant 0 : index
    %c0_13 = arith.constant 0 : index
    %18 = vector.load %arg6[%c0_12, %c0_13] : memref<128x128xbf16, #tpu.memory_space<vmem>>, vector<128x128xbf16>
    %cst_14 = arith.constant dense<0.000000e+00> : vector<128x128xf32>
    %19 = tpu.matmul %17, %18, %cst_14 {dimension_numbers = #tpu.dot_dimension_numbers<[1], [0], [0], [1], [0, 0, 1, 1], [], []>} : vector<128x128xbf16>, vector<128x128xbf16>, vector<128x128xf32> -> vector<128x128xf32>
    %c0_15 = arith.constant 0 : index
    %c0_16 = arith.constant 0 : index
    %20 = vector.load %arg7[%c0_15, %c0_16] : memref<1x128xf32, #tpu.memory_space<vmem>>, vector<1x128xf32>
    %21 = vector.broadcast %20 : vector<1x128xf32> to vector<128x128xf32>
    %22 = arith.addf %19, %21 : vector<128x128xf32>
    %c0_17 = arith.constant 0 : index
    %c0_18 = arith.constant 0 : index
    %23 = vector.load %arg8[%c0_17, %c0_18] : memref<128x128xf32, #tpu.memory_space<vmem>>, vector<128x128xf32>
    tpu.vector_store %arg8[%c0_17, %c0_18], %22 {strides = array<i32>} : memref<128x128xf32, #tpu.memory_space<vmem>>, vector<128x128xf32>,
    return
  }
  func.func @transform_0(%arg0: i32) -> (i32, i32) {
    %c0_i32 = arith.constant 0 : i32
    %c0_i32_0 = arith.constant 0 : i32
    return %arg0, %c0_i32 : i32, i32
  }
  func.func @transform_1(%arg0: i32) -> (i32, i32) {
    %c0_i32 = arith.constant 0 : i32
    %c0_i32_0 = arith.constant 0 : i32
    %c0_i32_1 = arith.constant 0 : i32
    return %c0_i32, %c0_i32_0 : i32, i32
  }
  func.func @transform_2(%arg0: i32) -> (i32, i32) {
    %c0_i32 = arith.constant 0 : i32
    %c0_i32_0 = arith.constant 0 : i32
    %c0_i32_1 = arith.constant 0 : i32
    return %c0_i32, %c0_i32_0 : i32, i32
  }
  func.func @transform_3(%arg0: i32) -> (i32, i32) {
    %c0_i32 = arith.constant 0 : i32
    %c0_i32_0 = arith.constant 0 : i32
    %c0_i32_1 = arith.constant 0 : i32
    return %c0_i32, %c0_i32_0 : i32, i32
  }
  func.func @transform_4(%arg0: i32) -> (i32, i32) {
    %c0_i32 = arith.constant 0 : i32
    %c0_i32_0 = arith.constant 0 : i32
    %c0_i32_1 = arith.constant 0 : i32
    return %c0_i32, %c0_i32_0 : i32, i32
  }
  func.func @transform_5(%arg0: i32) -> (i32, i32) {
    %c0_i32 = arith.constant 0 : i32
    %c0_i32_0 = arith.constant 0 : i32
    %c0_i32_1 = arith.constant 0 : i32
    return %c0_i32, %c0_i32_0 : i32, i32
  }
  func.func @transform_6(%arg0: i32) -> (i32, i32) {
    %c0_i32 = arith.constant 0 : i32
    %c0_i32_0 = arith.constant 0 : i32
    %c0_i32_1 = arith.constant 0 : i32
    return %c0_i32, %c0_i32_0 : i32, i32
  }
  func.func @transform_7(%arg0: i32) -> (i32, i32) {
    %c0_i32 = arith.constant 0 : i32
    %c0_i32_0 = arith.constant 0 : i32
    return %arg0, %c0_i32 : i32, i32
  }
}

</mosaic_0001>

<bundles_post_ra>
// kernel: mlp_forward.1
= control target key start
LH: loop header
LB: loop body
LE: loop exit
PB: predicated region body
PF: predicated region fallthrough
CT: control target
= control target key end

     0   :  { %s1359_s24 = smov 0   ;;  %s1610_s0 = inlined_call_operand.vmem [shape: f32[256,128], index: 0, kind: input, shape index: {}]   ;;  %s1611_s1 = inlined_call_operand.vmem [shape: bf16[128,256], index: 1, kind: input, shape index: {}]   ;;  %s1612_s2 = inlined_call_operand.vmem [shape: f32[1,256], index: 2, kind: input, shape index: {}]   ;;  %s1613_s3 = inlined_call_operand.vmem [shape: bf16[256,128], index: 3, kind: input, shape index: {}]   ;;  %s1614_s4 = inlined_call_operand.vmem [shape: f32[1,128], index: 4, kind: input, shape index: {}]   ;;  %s1615_s5 = inlined_call_operand.vmem [shape: bf16[128,128], index: 5, kind: input, shape index: {}]   ;;  %s1616_s6 = inlined_call_operand.vmem [shape: f32[1,128], index: 6, kind: input, shape index: {}]   ;;  %s1617_s7 = inlined_call_operand.vmem [shape: f32[256,128], index: 7, kind: output, shape index: {}]  }
   0x1 LB: > { %s1072_s25 = sadd.s32 4294967295, %s1316_s24   ;;  %p1076_p0 = scmp.ge.s32.totalorder %s1316_s24, 1  ;;  %s1316_s24 = sphi %s1359_s24, %s17_s24  }
   0x2   : > { %p238_p1 = scmp.lt.s32.totalorder %s1316_s24, 3 }
   0x4   : > { %p239_p2 = pnand %p1076_p0, %p238_p1 }
   0x5   : > { %v1262_v0 = vld [vmem:[%s1611_s1 + $0x4] ss:$8 sps:$4 sm:$0xff] (!%p239_p2)   ;;  %v1264_v1 = vld [vmem:[%s1611_s1] ss:$8 sps:$4 sm:$0xff] (!%p239_p2)   ;;  %v1318_v2 = vmov (!%p239_p2), 0   ;;  %s1077_s17 = sshll.u32 (!%p239_p2), %s1072_s25, 4  ;;  %v325_v60 = vlaneseq (!%p239_p2) }
   0x6   : > { %242 = sbr.rel (%p239_p2) target bundleno = 757 (0x2f5), region = 48  ;;  %447 = vmatprep.mubr.bf16.mxu0 (!%p239_p2), %v1318_v2  ;;  %415 = vmatprep.subr.bf16.mxu0 (!%p239_p2), %v1262_v0  ;;  %v1265_v3 = vld [vmem:[%s1611_s1 + $0x14] ss:$8 sps:$4 sm:$0xff] (!%p239_p2)   ;;  %v1267_v4 = vld [vmem:[%s1611_s1 + $0x10] ss:$8 sps:$4 sm:$0xff] (!%p239_p2)   ;;  %p271_p3 = scmp.lt.s32.totalorder (!%p239_p2), %s1077_s17, 31 }
   0x7   : > { %416 = vmatpush1.bf16.msra.mxu0 (!%p239_p2), %v1264_v1  ;;  %v1268_v5 = vld [vmem:[%s1611_s1 + $0x24] ss:$8 sps:$4 sm:$0xff] (!%p239_p2)   ;;  %v1270_v6 = vld [vmem:[%s1611_s1 + $0x20] ss:$8 sps:$4 sm:$0xff] (!%p239_p2)   ;;  %v1271_v7 = vld [vmem:[%s1611_s1 + $0x34] ss:$8 sps:$4 sm:$0xff] (!%p239_p2)  }
   0x8   : > { %417 = vmatprep.subr.bf16.mxu0 (!%p239_p2), %v1265_v3  ;;  %v1273_v8 = vld [vmem:[%s1611_s1 + $0x30] ss:$8 sps:$4 sm:$0xff] (!%p239_p2)   ;;  %v1274_v9 = vld [vmem:[%s1611_s1 + $0x44] ss:$8 sps:$4 sm:$0xff] (!%p239_p2)   ;;  %v1276_v10 = vld [vmem:[%s1611_s1 + $0x40] ss:$8 sps:$4 sm:$0xff] (!%p239_p2)  }
   0x9   : > { %v1277_v11 = vld [vmem:[%s1611_s1 + $0x54] ss:$8 sps:$4 sm:$0xff] (!%p239_p2)   ;;  %v1286_v12 = vld [vmem:[%s1613_s3 + $0x40] sm:$0xff] (!%p239_p2)   ;;  %v1279_v13 = vld [vmem:[%s1611_s1 + $0x50] ss:$8 sps:$4 sm:$0xff] (!%p239_p2)   ;;  %v326_v61 = vshrl.u32 (!%p239_p2), %v325_v60, 7 }
   0xa   : > { %v1287_v14 = vld [vmem:[%s1613_s3] sm:$0xff] (!%p239_p2)   ;;  %1125 = vmatprep.subr.bf16.mxu1 (!%p239_p2), %v1286_v12  ;;  %v1288_v16 = vld [vmem:[%s1613_s3 + $0x48] sm:$0xff] (!%p239_p2)   ;;  %v1290_v18 = vld [vmem:[%s1613_s3 + $0x50] sm:$0xff] (!%p239_p2)  }
   0xb   : > { %418 = vmatpush1.bf16.msra.mxu0 (!%p239_p2), %v1267_v4  ;;  %v1280_v15 = vld [vmem:[%s1611_s1 + $0x64] ss:$8 sps:$4 sm:$0xff] (!%p239_p2)   ;;  %1126 = vmatpush3.bf16.msra.mxu1 (!%p239_p2), %v1287_v14  ;;  %v1282_v19 = vld [vmem:[%s1611_s1 + $0x60] ss:$8 sps:$4 sm:$0xff] (!%p239_p2)   ;;  %v1283_v20 = vld [vmem:[%s1611_s1 + $0x74] ss:$8 sps:$4 sm:$0xff] (!%p239_p2)  }
   0xc   : > { %419 = vmatprep.subr.bf16.mxu0 (!%p239_p2), %v1268_v5  ;;  %v1289_v17 = vld [vmem:[%s1613_s3 + $0x8] sm:$0xff] (!%p239_p2)   ;;  %1127 = vmatprep.subr.bf16.mxu1 (!%p239_p2), %v1288_v16  ;;  %v1291_v21 = vld [vmem:[%s1613_s3 + $0x10] sm:$0xff] (!%p239_p2)   ;;  %v1292_v22 = vld [vmem:[%s1613_s3 + $0x58] sm:$0xff] (!%p239_p2)   ;;  %v327_v62 = vsub.s32 (!%p239_p2), 0, %v326_v61  ;;  %v331_v0 = vsub.s32 (!%p239_p2), 1, %v326_v61 }
   0xd   : > { %s1619_s17 = smov (!%p271_p3, %s1077_s17), 31  ;;  %v1285_v23 = vld [vmem:[%s1611_s1 + $0x70] ss:$8 sps:$4 sm:$0xff]   ;;  %v1294_v27 = vld [vmem:[%s1613_s3 + $0x60] sm:$0xff]   ;;  %v1296_v30 = vld [vmem:[%s1613_s3 + $0x68] sm:$0xff]  }
   0xe   : > { %s1078_s14 = sshll.u32 %s1619_s17, 3  ;;  %v1293_v26 = vld [vmem:[%s1613_s3 + $0x18] sm:$0xff]   ;;  %v1295_v28 = vld [vmem:[%s1613_s3 + $0x20] sm:$0xff]   ;;  %v1297_v52 = vld [vmem:[%s1613_s3 + $0x28] sm:$0xff]  }
   0xf   : > { %420 = vmatpush1.bf16.msra.mxu0 %v1270_v6  ;;  %s1436_s25 = scalar_lea.vmem %s1610_s0, %s1078_s14  ;;  %1128 = vmatpush3.bf16.msra.mxu1 %v1289_v17  ;;  %v1298_v53 = vld [vmem:[%s1613_s3 + $0x70] sm:$0xff]   ;;  %v1300_v55 = vld [vmem:[%s1613_s3 + $0x78] sm:$0xff]   ;;  %v1302_v57 = vld [vmem:[%s1615_s5] sm:$0xff]   ;;  %s1589_s13 = scalar_lea.vmem %s1617_s7, %s1078_s14 }
  0x10   : > { %421 = vmatprep.subr.bf16.mxu0 %v1271_v7  ;;  %1129 = vmatprep.subr.bf16.mxu1 %v1290_v18  ;;  %v283_v24 = vld [vmem:[%s1436_s25] sm:$0xff]  ;;  %v284_v25 = vld [vmem:[%s1436_s25 + $0x8] sm:$0xff]  ;;  %v285_v31 = vld [vmem:[%s1436_s25 + $0x10] sm:$0xff] }
  0x11   : > { %v299_v29 = vpack.c.bf16 %v284_v25, %v283_v24  ;;  %v286_v32 = vld [vmem:[%s1436_s25 + $0x18] sm:$0xff]  ;;  %v287_v34 = vld [vmem:[%s1436_s25 + $0x20] sm:$0xff]  ;;  %v288_v35 = vld [vmem:[%s1436_s25 + $0x28] sm:$0xff] }
  0x12   : > { %v300_v33 = vpack.c.bf16 %v286_v32, %v285_v31  ;;  %v301_v36 = vpack.c.bf16 %v288_v35, %v287_v34  ;;  %v289_v37 = vld [vmem:[%s1436_s25 + $0x30] sm:$0xff]  ;;  %v290_v38 = vld [vmem:[%s1436_s25 + $0x38] sm:$0xff]  ;;  %v291_v40 = vld [vmem:[%s1436_s25 + $0x40] sm:$0xff] }
  0x13   : > { %422 = vmatpush1.bf16.msra.mxu0 %v1273_v8  ;;  %1130 = vmatpush3.bf16.msra.mxu1 %v1291_v21  ;;  %v302_v39 = vpack.c.bf16 %v290_v38, %v289_v37  ;;  %v292_v41 = vld [vmem:[%s1436_s25 + $0x48] sm:$0xff]  ;;  %v293_v43 = vld [vmem:[%s1436_s25 + $0x50] sm:$0xff]  ;;  %v294_v44 = vld [vmem:[%s1436_s25 + $0x58] sm:$0xff] }
  0x14   : > { %423 = vmatprep.subr.bf16.mxu0 %v1274_v9  ;;  %1131 = vmatprep.subr.bf16.mxu1 %v1292_v22  ;;  %v303_v42 = vpack.c.bf16 %v292_v41, %v291_v40  ;;  %v304_v45 = vpack.c.bf16 %v294_v44, %v293_v43  ;;  %v295_v46 = vld [vmem:[%s1436_s25 + $0x60] sm:$0xff]  ;;  %v296_v47 = vld [vmem:[%s1436_s25 + $0x68] sm:$0xff]  ;;  %v297_v49 = vld [vmem:[%s1436_s25 + $0x70] sm:$0xff] }
  0x15   : > { %v305_v48 = vpack.c.bf16 %v296_v47, %v295_v46  ;;  %v298_v50 = vld [vmem:[%s1436_s25 + $0x78] sm:$0xff]  ;;  %v1299_v54 = vld [vmem:[%s1613_s3 + $0x30] sm:$0xff]   ;;  %v1303_v58 = vld [vmem:[%s1615_s5 + $0x8] sm:$0xff]  }
  0x16   : > { %v306_v51 = vpack.c.bf16 %v298_v50, %v297_v49  ;;  %v1301_v56 = vld [vmem:[%s1613_s3 + $0x38] sm:$0xff]   ;;  %v1304_v59 = vld [vmem:[%s1615_s5 + $0x10] sm:$0xff]   ;;  %v323_v63 = vld [vmem:[%s1612_s2] sm:$0x3] }
  0x17   : > { %424 = vmatpush1.bf16.msra.mxu0 %v1276_v10  ;;  %1132 = vmatpush3.bf16.msra.mxu1 %v1293_v26  ;;  %v1509_v1 = vrot.slane %v323_v63, %v327_v62 }
  0x18   : > { %425 = vmatprep.subr.bf16.mxu0 %v1277_v11  ;;  %1133 = vmatprep.subr.bf16.mxu1 %v1294_v27 }
  0x1b   : > { %426 = vmatpush1.bf16.msra.mxu0 %v1279_v13  ;;  %1134 = vmatpush3.bf16.msra.mxu1 %v1295_v28 }
  0x1c   : > { %427 = vmatprep.subr.bf16.mxu0 %v1280_v15  ;;  %1135 = vmatprep.subr.bf16.mxu1 %v1296_v30 }
  0x1f   : > { %428 = vmatpush1.bf16.msra.mxu0 %v1282_v19  ;;  %1136 = vmatpush3.bf16.msra.mxu1 %v1297_v52 }
  0x20   : > { %429 = vmatprep.subr.bf16.mxu0 %v1283_v20  ;;  %1137 = vmatprep.subr.bf16.mxu1 %v1298_v53 }
  0x23   : > { %430 = vmatpush1.bf16.msra.mxu0 %v1285_v23  ;;  %1138 = vmatpush3.bf16.msra.mxu1 %v1299_v54 }
  0x24   : > { %1139 = vmatprep.subr.bf16.mxu1 %v1300_v55  ;;  %1205 = vmatprep.subr.bf16.mxu0 %v1302_v57 }
  0x26   : > { %448 = vmatmul.mubr.bf16.vlgmr.msra.gmra.mrb[0].mxu0 %v299_v29 }
  0x27   : > { %457 = vmatprep.mubr.bf16.mxu0 %v1318_v2  ;;  %1140 = vmatpush3.bf16.msra.mxu1 %v1301_v56 }
  0x28   : > { %1237 = vmatprep.subr.bf16.mxu1 %v1302_v57  ;;  %1206 = vmatpush3.bf16.msra.mxu0 %v1302_v57 }
  0x29   : > { %1207 = vmatprep.subr.bf16.mxu0 %v1303_v58 }
  0x2c   : > { %1208 = vmatpush3.bf16.msra.mxu0 %v1303_v58 }
  0x2d   : > { %1209 = vmatprep.subr.bf16.mxu0 %v1304_v59 }
  0x2e   : > { %458 = vmatmul.mubr.bf16.gmra.mrb[4].mxu0 %v300_v33 }
  0x2f   : > { %467 = vmatprep.mubr.bf16.mxu0 %v1318_v2 }
  0x30   : > { %1210 = vmatpush3.bf16.msra.mxu0 %v1304_v59 }
  0x36   : > { %468 = vmatmul.mubr.bf16.gmra.mrb[8].mxu0 %v301_v36 }
  0x37   : > { %477 = vmatprep.mubr.bf16.mxu0 %v1318_v2 }
  0x3e   : > { %478 = vmatmul.mubr.bf16.gmra.mrb[12].mxu0 %v302_v39 }
  0x3f   : > { %487 = vmatprep.mubr.bf16.mxu0 %v1318_v2 }
  0x46   : > { %488 = vmatmul.mubr.bf16.gmra.mrb[16].mxu0 %v303_v42 }
  0x47   : > { %497 = vmatprep.mubr.bf16.mxu0 %v1318_v2 }
  0x4e   : > { %498 = vmatmul.mubr.bf16.gmra.mrb[20].mxu0 %v304_v45 }
  0x4f   : > { %507 = vmatprep.mubr.bf16.mxu0 %v1318_v2 }
  0x56   : > { %508 = vmatmul.mubr.bf16.gmra.mrb[24].mxu0 %v305_v48 }
  0x57   : > { %517 = vmatprep.mubr.bf16.mxu0 %v1318_v2  ;;  %v1511_v2 = vrot.slane %v323_v63, %v331_v0 }
  0x5e   : > { %518 = vmatmul.mubr.bf16.gmra.mrb[28].mxu0 %v306_v51 }
  0xf9   : > { %v449_v3 = vpop.f32.mrb[0].mxu0 }
  0xfa   : > { %v450_v4 = vadd.f32 %v449_v3, %v1509_v1  ;;  %v451_v5 = vpop.f32.mrb[1].mxu0 }
  0xfb   : > { %v452_v6 = vadd.f32 %v451_v5, %v1511_v2  ;;  %v453_v7 = vpop.f32.mrb[2].mxu0 }
  0xfc   : > { %v454_v8 = vadd.f32 %v453_v7, %v1509_v1  ;;  %v455_v9 = vpop.f32.mrb[3].mxu0  ;;  %v528_v11 = vmax.f32 %v450_v4, 0.0 }
  0xfd   : > { %v456_v10 = vadd.f32 %v455_v9, %v1511_v2  ;;  %v529_v13 = vmax.f32 %v452_v6, 0.0 }
  0xfe   : > { %v530_v12 = vmax.f32 %v454_v8, 0.0 }
  0xff   : > { %v531_v14 = vmax.f32 %v456_v10, 0.0 }
 0x100   : > { %v560_v15 = vpack.c.bf16 %v530_v12, %v528_v11 }
 0x101   : > { %v459_v16 = vpop.f32.mrb[4].mxu0  ;;  %v561_v17 = vpack.c.bf16 %v531_v14, %v529_v13 }
 0x102   : > { %v460_v18 = vadd.f32 %v459_v16, %v1509_v1  ;;  %v461_v19 = vpop.f32.mrb[5].mxu0 }
 0x103   : > { %v462_v20 = vadd.f32 %v461_v19, %v1511_v2  ;;  %v463_v21 = vpop.f32.mrb[6].mxu0  ;;  %743 = vmatprep.mubr.bf16.mxu1 %v561_v17 }
 0x104   : > { %v464_v22 = vadd.f32 %v463_v21, %v1509_v1  ;;  %v465_v23 = vpop.f32.mrb[7].mxu0  ;;  %744 = vmatmul.mubr.bf16.vlgmr.msra.gmra.mrb[0].mxu1 %v560_v15  ;;  %v532_v25 = vmax.f32 %v460_v18, 0.0 }
 0x105   : > { %v466_v24 = vadd.f32 %v465_v23, %v1511_v2  ;;  %1245 = vmatpush3.bf16.msra.mxu1 %v1302_v57  ;;  %v533_v27 = vmax.f32 %v462_v20, 0.0 }
 0x106   : > { %v534_v26 = vmax.f32 %v464_v22, 0.0  ;;  %1238 = vmatprep.subr.bf16.mxu1 %v1303_v58 }
 0x107   : > { %v535_v28 = vmax.f32 %v466_v24, 0.0 }
 0x108   : > { %v562_v29 = vpack.c.bf16 %v534_v26, %v532_v25 }
 0x109   : > { %v563_v30 = vpack.c.bf16 %v535_v28, %v533_v27  ;;  %v469_v31 = vpop.f32.mrb[8].mxu0  ;;  %1246 = vmatpush3.bf16.msra.mxu1 %v1303_v58 }
 0x10a   : > { %v470_v32 = vadd.f32 %v469_v31, %v1509_v1  ;;  %v471_v33 = vpop.f32.mrb[9].mxu0  ;;  %1239 = vmatprep.subr.bf16.mxu1 %v1304_v59 }
 0x10b   : > { %v472_v34 = vadd.f32 %v471_v33, %v1511_v2  ;;  %v473_v35 = vpop.f32.mrb[10].mxu0  ;;  %751 = vmatprep.mubr.bf16.mxu1 %v563_v30 }
 0x10c   : > { %v474_v36 = vadd.f32 %v473_v35, %v1509_v1  ;;  %v475_v37 = vpop.f32.mrb[11].mxu0  ;;  %752 = vmatmul.mubr.bf16.gmra.mrb[4].mxu1 %v562_v29  ;;  %v536_v39 = vmax.f32 %v470_v32, 0.0 }
 0x10d   : > { %v476_v38 = vadd.f32 %v475_v37, %v1511_v2  ;;  %1247 = vmatpush3.bf16.msra.mxu1 %v1304_v59  ;;  %v537_v41 = vmax.f32 %v472_v34, 0.0 }
 0x10e   : > { %v538_v40 = vmax.f32 %v474_v36, 0.0 }
 0x10f   : > { %v539_v42 = vmax.f32 %v476_v38, 0.0 }
 0x110   : > { %v564_v43 = vpack.c.bf16 %v538_v40, %v536_v39 }
 0x111   : > { %v565_v44 = vpack.c.bf16 %v539_v42, %v537_v41  ;;  %v479_v45 = vpop.f32.mrb[12].mxu0 }
 0x112   : > { %v480_v46 = vadd.f32 %v479_v45, %v1509_v1  ;;  %v481_v47 = vpop.f32.mrb[13].mxu0 }
 0x113   : > { %v482_v48 = vadd.f32 %v481_v47, %v1511_v2  ;;  %v483_v49 = vpop.f32.mrb[14].mxu0  ;;  %759 = vmatprep.mubr.bf16.mxu1 %v565_v44 }
 0x114   : > { %v484_v50 = vadd.f32 %v483_v49, %v1509_v1  ;;  %v485_v51 = vpop.f32.mrb[15].mxu0  ;;  %760 = vmatmul.mubr.bf16.gmra.mrb[8].mxu1 %v564_v43  ;;  %v540_v53 = vmax.f32 %v480_v46, 0.0 }
 0x115   : > { %v486_v52 = vadd.f32 %v485_v51, %v1511_v2  ;;  %v541_v55 = vmax.f32 %v482_v48, 0.0 }
 0x116   : > { %v542_v54 = vmax.f32 %v484_v50, 0.0 }
 0x117   : > { %v543_v56 = vmax.f32 %v486_v52, 0.0 }
 0x118   : > { %v566_v57 = vpack.c.bf16 %v542_v54, %v540_v53  ;;  %v1305_v53 = vld [vmem:[%s1615_s5 + $0x18] sm:$0xff]   ;;  %v1308_v54 = vld [vmem:[%s1615_s5 + $0x30] sm:$0xff]  }
 0x119   : > { %v567_v58 = vpack.c.bf16 %v543_v56, %v541_v55  ;;  %v489_v59 = vpop.f32.mrb[16].mxu0  ;;  %1211 = vmatprep.subr.bf16.mxu0 %v1305_v53  ;;  %1240 = vmatprep.subr.bf16.mxu1 %v1305_v53  ;;  %v1309_v55 = vld [vmem:[%s1615_s5 + $0x38] sm:$0xff]  }
 0x11a   : > { %v490_v60 = vadd.f32 %v489_v59, %v1509_v1  ;;  %v491_v61 = vpop.f32.mrb[17].mxu0  ;;  %1212 = vmatpush3.bf16.msra.mxu0 %v1305_v53  ;;  %1248 = vmatpush3.bf16.msra.mxu1 %v1305_v53 }
 0x11b   : > { %v492_v62 = vadd.f32 %v491_v61, %v1511_v2  ;;  %v493_v63 = vpop.f32.mrb[18].mxu0  ;;  %767 = vmatprep.mubr.bf16.mxu1 %v567_v58 }
 0x11c   : > { %v494_v0 = vadd.f32 %v493_v63, %v1509_v1  ;;  %v495_v3 = vpop.f32.mrb[19].mxu0  ;;  %768 = vmatmul.mubr.bf16.gmra.mrb[12].mxu1 %v566_v57  ;;  %v544_v5 = vmax.f32 %v490_v60, 0.0  ;;  %v1563_v57 = vld [vmem:[%s1614_s4] ss:$0 sm:$0xff] }
 0x11d   : > { %v496_v4 = vadd.f32 %v495_v3, %v1511_v2  ;;  %v545_v7 = vmax.f32 %v492_v62, 0.0 }
 0x11e   : > { %v546_v6 = vmax.f32 %v494_v0, 0.0 }
 0x11f   : > { %v547_v8 = vmax.f32 %v496_v4, 0.0 }
 0x120   : > { %v568_v9 = vpack.c.bf16 %v546_v6, %v544_v5 }
 0x121   : > { %v569_v10 = vpack.c.bf16 %v547_v8, %v545_v7  ;;  %v499_v11 = vpop.f32.mrb[20].mxu0 }
 0x122   : > { %v500_v12 = vadd.f32 %v499_v11, %v1509_v1  ;;  %v501_v13 = vpop.f32.mrb[21].mxu0 }
 0x123   : > { %v502_v14 = vadd.f32 %v501_v13, %v1511_v2  ;;  %v503_v15 = vpop.f32.mrb[22].mxu0  ;;  %775 = vmatprep.mubr.bf16.mxu1 %v569_v10 }
 0x124   : > { %v504_v16 = vadd.f32 %v503_v15, %v1509_v1  ;;  %v505_v17 = vpop.f32.mrb[23].mxu0  ;;  %776 = vmatmul.mubr.bf16.gmra.mrb[16].mxu1 %v568_v9  ;;  %v548_v19 = vmax.f32 %v500_v12, 0.0 }
 0x125   : > { %v506_v18 = vadd.f32 %v505_v17, %v1511_v2  ;;  %v549_v21 = vmax.f32 %v502_v14, 0.0 }
 0x126   : > { %v550_v20 = vmax.f32 %v504_v16, 0.0 }
 0x127   : > { %v551_v22 = vmax.f32 %v506_v18, 0.0 }
 0x128   : > { %v570_v23 = vpack.c.bf16 %v550_v20, %v548_v19 }
 0x129   : > { %v571_v24 = vpack.c.bf16 %v551_v22, %v549_v21  ;;  %v509_v25 = vpop.f32.mrb[24].mxu0 }
 0x12a   : > { %v510_v26 = vadd.f32 %v509_v25, %v1509_v1  ;;  %v511_v27 = vpop.f32.mrb[25].mxu0 }
 0x12b   : > { %v512_v28 = vadd.f32 %v511_v27, %v1511_v2  ;;  %v513_v29 = vpop.f32.mrb[26].mxu0  ;;  %783 = vmatprep.mubr.bf16.mxu1 %v571_v24 }
 0x12c   : > { %v514_v30 = vadd.f32 %v513_v29, %v1509_v1  ;;  %v515_v31 = vpop.f32.mrb[27].mxu0  ;;  %784 = vmatmul.mubr.bf16.gmra.mrb[20].mxu1 %v570_v23  ;;  %v552_v33 = vmax.f32 %v510_v26, 0.0 }
 0x12d   : > { %v516_v32 = vadd.f32 %v515_v31, %v1511_v2  ;;  %v553_v35 = vmax.f32 %v512_v28, 0.0 }
 0x12e   : > { %v554_v34 = vmax.f32 %v514_v30, 0.0 }
 0x12f   : > { %v555_v36 = vmax.f32 %v516_v32, 0.0 }
 0x130   : > { %v572_v37 = vpack.c.bf16 %v554_v34, %v552_v33 }
 0x131   : > { %v573_v38 = vpack.c.bf16 %v555_v36, %v553_v35  ;;  %v519_v39 = vpop.f32.mrb[28].mxu0 }
 0x132   : > { %v520_v40 = vadd.f32 %v519_v39, %v1509_v1  ;;  %v521_v41 = vpop.f32.mrb[29].mxu0 }
 0x133   : > { %v522_v42 = vadd.f32 %v521_v41, %v1511_v2  ;;  %v523_v43 = vpop.f32.mrb[30].mxu0  ;;  %791 = vmatprep.mubr.bf16.mxu1 %v573_v38 }
 0x134   : > { %v524_v44 = vadd.f32 %v523_v43, %v1509_v1  ;;  %v525_v45 = vpop.f32.mrb[31].mxu0  ;;  %792 = vmatmul.mubr.bf16.gmra.mrb[24].mxu1 %v572_v37  ;;  %v556_v47 = vmax.f32 %v520_v40, 0.0  ;;  %v1306_v1 = vld [vmem:[%s1615_s5 + $0x20] sm:$0xff]  }
 0x135   : > { %v526_v46 = vadd.f32 %v525_v45, %v1511_v2  ;;  %v557_v49 = vmax.f32 %v522_v42, 0.0  ;;  %1213 = vmatprep.subr.bf16.mxu0 %v1306_v1  ;;  %1241 = vmatprep.subr.bf16.mxu1 %v1306_v1  ;;  %v1307_v2 = vld [vmem:[%s1615_s5 + $0x28] sm:$0xff]  }
 0x136   : > { %v558_v48 = vmax.f32 %v524_v44, 0.0  ;;  %1214 = vmatpush3.bf16.msra.mxu0 %v1306_v1  ;;  %1249 = vmatpush3.bf16.msra.mxu1 %v1306_v1 }
 0x137   : > { %v559_v50 = vmax.f32 %v526_v46, 0.0  ;;  %1215 = vmatprep.subr.bf16.mxu0 %v1307_v2  ;;  %1242 = vmatprep.subr.bf16.mxu1 %v1307_v2 }
 0x138   : > { %v574_v51 = vpack.c.bf16 %v558_v48, %v556_v47 }
 0x139   : > { %v575_v52 = vpack.c.bf16 %v559_v50, %v557_v49 }
 0x13a   : > { %1216 = vmatpush3.bf16.msra.mxu0 %v1307_v2  ;;  %1250 = vmatpush3.bf16.msra.mxu1 %v1307_v2 }
 0x13b   : > { %799 = vmatprep.mubr.bf16.mxu1 %v575_v52  ;;  %1217 = vmatprep.subr.bf16.mxu0 %v1308_v54 }
 0x13c   : > { %800 = vmatmul.mubr.bf16.gmra.mrb[28].mxu1 %v574_v51  ;;  %1243 = vmatprep.subr.bf16.mxu1 %v1308_v54 }
 0x13e   : > { %1218 = vmatpush3.bf16.msra.mxu0 %v1308_v54  ;;  %1251 = vmatpush3.bf16.msra.mxu1 %v1308_v54 }
 0x13f   : > { %1219 = vmatprep.subr.bf16.mxu0 %v1309_v55  ;;  %1244 = vmatprep.subr.bf16.mxu1 %v1309_v55 }
 0x142   : > { %1220 = vmatpush3.bf16.msra.mxu0 %v1309_v55  ;;  %1252 = vmatpush3.bf16.msra.mxu1 %v1309_v55 }
 0x1d7   : > { %v1141_v56 = vpop.f32.mrb[0].mxu1 }
 0x1d8   : > { %v1142_v58 = vpop.f32.mrb[1].mxu1 }
 0x1d9   : > { %v1143_v59 = vadd.f32 %v1142_v58, %v1141_v56  ;;  %v1144_v60 = vpop.f32.mrb[2].mxu1 }
 0x1da   : > { %v1145_v61 = vpop.f32.mrb[3].mxu1 }
 0x1db   : > { %v746_v62 = vadd.f32 %v1143_v59, %v1563_v57  ;;  %v1146_v63 = vadd.f32 %v1145_v61, %v1144_v60 }
 0x1dd   : > { %v749_v0 = vadd.f32 %v1146_v63, %v1563_v57  ;;  %v808_v3 = vmax.f32 %v746_v62, 0.0 }
 0x1df   : > { %v809_v4 = vmax.f32 %v749_v0, 0.0  ;;  %v1147_v5 = vpop.f32.mrb[4].mxu1 }
 0x1e0   : > { %v1148_v6 = vpop.f32.mrb[5].mxu1 }
 0x1e1   : > { %v1149_v7 = vadd.f32 %v1148_v6, %v1147_v5  ;;  %v1150_v8 = vpop.f32.mrb[6].mxu1  ;;  %v824_v9 = vpack.c.bf16 %v809_v4, %v808_v3 }
 0x1e2   : > { %v1151_v10 = vpop.f32.mrb[7].mxu1 }
 0x1e3   : > { %v754_v11 = vadd.f32 %v1149_v7, %v1563_v57  ;;  %v1152_v12 = vadd.f32 %v1151_v10, %v1150_v8  ;;  %1221 = vmatprep.mubr.bf16.mxu0 %v824_v9 }
 0x1e5   : > { %v757_v13 = vadd.f32 %v1152_v12, %v1563_v57  ;;  %v810_v14 = vmax.f32 %v754_v11, 0.0 }
 0x1e7   : > { %v811_v15 = vmax.f32 %v757_v13, 0.0  ;;  %v1153_v16 = vpop.f32.mrb[8].mxu1 }
 0x1e8   : > { %v1154_v17 = vpop.f32.mrb[9].mxu1 }
 0x1e9   : > { %v825_v18 = vpack.c.bf16 %v811_v15, %v810_v14  ;;  %v1155_v19 = vadd.f32 %v1154_v17, %v1153_v16  ;;  %v1156_v20 = vpop.f32.mrb[10].mxu1 }
 0x1ea   : > { %v1157_v21 = vpop.f32.mrb[11].mxu1 }
 0x1eb   : > { %v762_v22 = vadd.f32 %v1155_v19, %v1563_v57  ;;  %v1158_v23 = vadd.f32 %v1157_v21, %v1156_v20  ;;  %1222 = vmatmul.mubr.bf16.vlgmr.msra.gmra.mrb[32].mxu0 %v825_v18  ;;  %v1114_v20 = vld [vmem:[%s1616_s6] ss:$0 sm:$0xff] }
 0x1ed   : > { %v765_v24 = vadd.f32 %v1158_v23, %v1563_v57  ;;  %v812_v25 = vmax.f32 %v762_v22, 0.0 }
 0x1ef   : > { %v813_v26 = vmax.f32 %v765_v24, 0.0  ;;  %v1159_v27 = vpop.f32.mrb[12].mxu1 }
 0x1f0   : > { %v1160_v28 = vpop.f32.mrb[13].mxu1 }
 0x1f1   : > { %v1161_v29 = vadd.f32 %v1160_v28, %v1159_v27  ;;  %v1162_v30 = vpop.f32.mrb[14].mxu1  ;;  %v826_v31 = vpack.c.bf16 %v813_v26, %v812_v25 }
 0x1f2   : > { %v1163_v32 = vpop.f32.mrb[15].mxu1 }
 0x1f3   : > { %v770_v33 = vadd.f32 %v1161_v29, %v1563_v57  ;;  %v1164_v34 = vadd.f32 %v1163_v32, %v1162_v30  ;;  %1225 = vmatprep.mubr.bf16.mxu0 %v826_v31 }
 0x1f5   : > { %v773_v35 = vadd.f32 %v1164_v34, %v1563_v57  ;;  %v814_v36 = vmax.f32 %v770_v33, 0.0 }
 0x1f7   : > { %v815_v37 = vmax.f32 %v773_v35, 0.0  ;;  %v1165_v38 = vpop.f32.mrb[16].mxu1 }
 0x1f8   : > { %v1166_v39 = vpop.f32.mrb[17].mxu1 }
 0x1f9   : > { %v1167_v40 = vadd.f32 %v1166_v39, %v1165_v38  ;;  %v1168_v41 = vpop.f32.mrb[18].mxu1  ;;  %v827_v42 = vpack.c.bf16 %v815_v37, %v814_v36 }
 0x1fa   : > { %v1169_v43 = vpop.f32.mrb[19].mxu1 }
 0x1fb   : > { %v778_v44 = vadd.f32 %v1167_v40, %v1563_v57  ;;  %v1170_v45 = vadd.f32 %v1169_v43, %v1168_v41  ;;  %1226 = vmatmul.mubr.bf16.gmra.mrb[36].mxu0 %v827_v42 }
 0x1fd   : > { %v781_v46 = vadd.f32 %v1170_v45, %v1563_v57  ;;  %v816_v47 = vmax.f32 %v778_v44, 0.0 }
 0x1ff   : > { %v817_v48 = vmax.f32 %v781_v46, 0.0  ;;  %v1171_v49 = vpop.f32.mrb[20].mxu1 }
 0x200   : > { %v1172_v50 = vpop.f32.mrb[21].mxu1 }
 0x201   : > { %v1173_v51 = vadd.f32 %v1172_v50, %v1171_v49  ;;  %v1174_v52 = vpop.f32.mrb[22].mxu1  ;;  %v828_v53 = vpack.c.bf16 %v817_v48, %v816_v47 }
 0x202   : > { %v1175_v1 = vpop.f32.mrb[23].mxu1 }
 0x203   : > { %v786_v2 = vadd.f32 %v1173_v51, %v1563_v57  ;;  %v1176_v54 = vadd.f32 %v1175_v1, %v1174_v52  ;;  %1229 = vmatprep.mubr.bf16.mxu1 %v828_v53 }
 0x205   : > { %v789_v55 = vadd.f32 %v1176_v54, %v1563_v57  ;;  %v818_v56 = vmax.f32 %v786_v2, 0.0 }
 0x207   : > { %v819_v58 = vmax.f32 %v789_v55, 0.0  ;;  %v1177_v59 = vpop.f32.mrb[24].mxu1 }
 0x208   : > { %v1178_v60 = vpop.f32.mrb[25].mxu1 }
 0x209   : > { %v829_v61 = vpack.c.bf16 %v819_v58, %v818_v56  ;;  %v1179_v62 = vadd.f32 %v1178_v60, %v1177_v59  ;;  %v1180_v63 = vpop.f32.mrb[26].mxu1 }
 0x20a   : > { %v1181_v0 = vpop.f32.mrb[27].mxu1 }
 0x20b   : > { %v794_v3 = vadd.f32 %v1179_v62, %v1563_v57  ;;  %v1182_v4 = vadd.f32 %v1181_v0, %v1180_v63  ;;  %1230 = vmatmul.mubr.bf16.vlgmr.msra.gmra.mrb[32].mxu1 %v829_v61 }
 0x20d   : > { %v797_v5 = vadd.f32 %v1182_v4, %v1563_v57  ;;  %v820_v6 = vmax.f32 %v794_v3, 0.0 }
 0x20f   : > { %v821_v7 = vmax.f32 %v797_v5, 0.0  ;;  %v1183_v8 = vpop.f32.mrb[28].mxu1 }
 0x210   : > { %v1184_v9 = vpop.f32.mrb[29].mxu1 }
 0x211   : > { %v1185_v10 = vadd.f32 %v1184_v9, %v1183_v8  ;;  %v1186_v11 = vpop.f32.mrb[30].mxu1  ;;  %v830_v12 = vpack.c.bf16 %v821_v7, %v820_v6 }
 0x212   : > { %v1187_v13 = vpop.f32.mrb[31].mxu1 }
 0x213   : > { %v802_v14 = vadd.f32 %v1185_v10, %v1563_v57  ;;  %v1188_v15 = vadd.f32 %v1187_v13, %v1186_v11  ;;  %1233 = vmatprep.mubr.bf16.mxu1 %v830_v12 }
 0x215   : > { %v805_v16 = vadd.f32 %v1188_v15, %v1563_v57  ;;  %v822_v17 = vmax.f32 %v802_v14, 0.0 }
 0x217   : > { %v823_v18 = vmax.f32 %v805_v16, 0.0 }
 0x219   : > { %v831_v19 = vpack.c.bf16 %v823_v18, %v822_v17 }
 0x21b   : > { %1234 = vmatmul.mubr.bf16.gmra.mrb[36].mxu1 %v831_v19 }
 0x2be   : > { %v1223_v21 = vpop.f32.mrb[32].mxu0 }
 0x2bf   : > { %v946_v57 = vadd.f32 %v1223_v21, %v1114_v20  ;;  %v937_v22 = vpop.f32.mrb[33].mxu0 }
 0x2c0   : > { %v938_v23 = vadd.f32 %v1114_v20, %v937_v22  ;;  %v1224_v24 = vpop.f32.mrb[34].mxu0 }
 0x2c1   : > { %1002 = vst [vmem:[%s1589_s13 + $0x10] sm:$0xff] %v946_v57  ;;  %v949_v25 = vadd.f32 %v1224_v24, %v1114_v20  ;;  %v940_v26 = vpop.f32.mrb[35].mxu0 }
 0x2c2   : > { %1000 = vst [vmem:[%s1589_s13] sm:$0xff] %v938_v23  ;;  %v941_v27 = vadd.f32 %v1114_v20, %v940_v26 }
 0x2c3   : > { %1003 = vst [vmem:[%s1589_s13 + $0x18] sm:$0xff] %v949_v25 }
 0x2c4   : > { %1001 = vst [vmem:[%s1589_s13 + $0x8] sm:$0xff] %v941_v27 }
 0x2ce   : > { %v1227_v28 = vpop.f32.mrb[36].mxu0 }
 0x2cf   : > { %v962_v29 = vadd.f32 %v1227_v28, %v1114_v20  ;;  %v953_v30 = vpop.f32.mrb[37].mxu0 }
 0x2d0   : > { %v954_v31 = vadd.f32 %v1114_v20, %v953_v30  ;;  %v1228_v32 = vpop.f32.mrb[38].mxu0 }
 0x2d1   : > { %1006 = vst [vmem:[%s1589_s13 + $0x30] sm:$0xff] %v962_v29  ;;  %v965_v33 = vadd.f32 %v1228_v32, %v1114_v20  ;;  %v956_v34 = vpop.f32.mrb[39].mxu0 }
 0x2d2   : > { %1004 = vst [vmem:[%s1589_s13 + $0x20] sm:$0xff] %v954_v31  ;;  %v957_v35 = vadd.f32 %v1114_v20, %v956_v34 }
 0x2d3   : > { %1007 = vst [vmem:[%s1589_s13 + $0x38] sm:$0xff] %v965_v33 }
 0x2d4   : > { %1005 = vst [vmem:[%s1589_s13 + $0x28] sm:$0xff] %v957_v35 }
 0x2de   : > { %v1231_v36 = vpop.f32.mrb[32].mxu1 }
 0x2df   : > { %v978_v37 = vadd.f32 %v1231_v36, %v1114_v20  ;;  %v969_v38 = vpop.f32.mrb[33].mxu1 }
 0x2e0   : > { %v970_v39 = vadd.f32 %v1114_v20, %v969_v38  ;;  %v1232_v40 = vpop.f32.mrb[34].mxu1 }
 0x2e1   : > { %1010 = vst [vmem:[%s1589_s13 + $0x50] sm:$0xff] %v978_v37  ;;  %v981_v41 = vadd.f32 %v1232_v40, %v1114_v20  ;;  %v972_v42 = vpop.f32.mrb[35].mxu1 }
 0x2e2   : > { %1008 = vst [vmem:[%s1589_s13 + $0x40] sm:$0xff] %v970_v39  ;;  %v973_v43 = vadd.f32 %v1114_v20, %v972_v42 }
 0x2e3   : > { %1011 = vst [vmem:[%s1589_s13 + $0x58] sm:$0xff] %v981_v41 }
 0x2e4   : > { %1009 = vst [vmem:[%s1589_s13 + $0x48] sm:$0xff] %v973_v43 }
 0x2ee   : > { %v1235_v44 = vpop.f32.mrb[36].mxu1 }
 0x2ef   : > { %v994_v45 = vadd.f32 %v1235_v44, %v1114_v20  ;;  %v985_v46 = vpop.f32.mrb[37].mxu1 }
 0x2f0   : > { %v986_v47 = vadd.f32 %v1114_v20, %v985_v46  ;;  %v1236_v48 = vpop.f32.mrb[38].mxu1 }
 0x2f1   : > { %1014 = vst [vmem:[%s1589_s13 + $0x70] sm:$0xff] %v994_v45  ;;  %v997_v49 = vadd.f32 %v1236_v48, %v1114_v20  ;;  %v988_v50 = vpop.f32.mrb[39].mxu1 }
 0x2f2   : > { %1012 = vst [vmem:[%s1589_s13 + $0x60] sm:$0xff] %v986_v47  ;;  %v989_v51 = vadd.f32 %v1114_v20, %v988_v50 }
 0x2f3   : > { %1015 = vst [vmem:[%s1589_s13 + $0x78] sm:$0xff] %v997_v49 }
 0x2f4   : > { %1013 = vst [vmem:[%s1589_s13 + $0x68] sm:$0xff] %v989_v51 }
 0x2f5 PF: > { %s17_s24 = sadd.s32 1, %s1316_s24  }
 0x2f6   : > { %p14_p4 = scmp.ge.s32.totalorder %s17_s24, 4  }
 0x2f8   :  { %16 = sbr.rel (!%p14_p4) target bundleno = 1 (0x1), region = 78 }

</bundles_post_ra>
